<compile_context>
chip_gen: v6e
topology: v6e:2x2x1
jax: 0.10.0
libtpu: 0.0.40
codegen_flags: <defaults>
</compile_context>

<pallas_src>
import functools

import jax
import jax.numpy as jnp
from jax.experimental import pallas as pl
from jax.experimental.pallas import tpu as pltpu

_LANE = 128        # vreg lane width
_ROW_ALIGN = 32    # sublane alignment that also covers int8 packing
_MAX_COLS = 512
_MAX_BLOCK_ROWS = 512


def _round_up(n, m):
    return ((n + m - 1) // m) * m


def _flat_layout(total):
    """Pick a lane-dense (rows, cols) slab and a row-block size for `total`
    elements.  cols is a multiple of 128, rows a multiple of the row block,
    so the grid divides evenly (no partial blocks anywhere)."""
    cols = _MAX_COLS
    while cols > _LANE and total < cols * _ROW_ALIGN:
        cols //= 2
    rows = _round_up(-(-total // cols), _ROW_ALIGN)
    tr = min(_MAX_BLOCK_ROWS, rows)
    rows = _round_up(rows, tr)
    return rows, cols, tr


# ----------------------------- kernels ------------------------------------ #

def _mask_kernel(bits_ref, mask_ref, *, threshold):
    # keep iff uniform uint32 >= round(p * 2^32)   (drop probability p)
    mask_ref[...] = (bits_ref[...] >= jnp.uint32(threshold)).astype(jnp.int8)


def _apply_kernel(mask_ref, x_ref, o_ref, *, scale):
    # all casts happen in-register; scale is folded into the multiply
    keep = mask_ref[...].astype(jnp.float32)
    x = x_ref[...].astype(jnp.float32)
    o_ref[...] = (x * keep * jnp.float32(scale)).astype(o_ref.dtype)


# ----------------------------- wrappers ------------------------------------ #

def _make_mask_2d(rows, cols, tr, p, key):
    bits = jax.random.bits(key, (rows, cols), dtype=jnp.uint32)
    if p <= 0.0:
        threshold = 0
    else:
        threshold = min(int(round(p * (1 << 32))), (1 << 32) - 1)
    return pl.pallas_call(
        functools.partial(_mask_kernel, threshold=threshold),
        out_shape=jax.ShapeDtypeStruct((rows, cols), jnp.int8),
        grid=(rows // tr,),
        in_specs=[pl.BlockSpec((tr, cols), lambda i: (i, 0))],
        out_specs=pl.BlockSpec((tr, cols), lambda i: (i, 0)),
        compiler_params=pltpu.CompilerParams(
            dimension_semantics=("parallel",)),
    )(bits)


def _apply_mask_2d(mask2d, x2d, scale, tr):
    rows, cols = x2d.shape
    return pl.pallas_call(
        functools.partial(_apply_kernel, scale=scale),
        out_shape=jax.ShapeDtypeStruct((rows, cols), x2d.dtype),
        grid=(rows // tr,),
        in_specs=[
            pl.BlockSpec((tr, cols), lambda i: (i, 0)),
            pl.BlockSpec((tr, cols), lambda i: (i, 0)),
        ],
        out_specs=pl.BlockSpec((tr, cols), lambda i: (i, 0)),
        compiler_params=pltpu.CompilerParams(
            dimension_semantics=("parallel",)),
    )(mask2d, x2d)


class NDropout:
    """JAX/Pallas port of BrainCog NDropout (same mask reused across calls)."""

    def __init__(self, p, seed=0):
        self.p = float(p)
        self.training = True
        self.mask = None        # cached int8 keep-bit mask, padded 2D slab
        self._layout = None     # (rows, cols, tr, total)
        self._key = jax.random.PRNGKey(seed)

    def n_reset(self):
        self.mask = None
        self._layout = None

    def create_mask(self, x):
        total = int(x.size)
        rows, cols, tr = _flat_layout(total)
        self._layout = (rows, cols, tr, total)
        self._key, sub = jax.random.split(self._key)
        self.mask = _make_mask_2d(rows, cols, tr, self.p, sub)

    def __call__(self, x):
        if not self.training:
            return x
        if self.mask is None:
            self.create_mask(x)
        rows, cols, tr, total = self._layout
        assert total == int(x.size), (
            "cached mask was built for a different shape; call n_reset()")
        x_flat = x.reshape(-1)
        pad = rows * cols - total
        if pad:
            x_flat = jnp.pad(x_flat, (0, pad))
        x2d = x_flat.reshape(rows, cols)
        scale = 0.0 if self.p >= 1.0 else 1.0 / (1.0 - self.p)
        out2d = _apply_mask_2d(self.mask, x2d, scale, tr)
        return out2d.reshape(-1)[:total].reshape(x.shape)


# ------------------------------- main -------------------------------------- #

if __name__ == "__main__":
    key = jax.random.PRNGKey(0)
    x = jax.random.normal(key, (2, 4, 16, 16), dtype=jnp.float32)

    drop = NDropout(p=0.5, seed=0)
    y1 = drop(x)
    y2 = drop(x)                       # must reuse the SAME cached mask
    jax.block_until_ready((y1, y2))

    scale = 1.0 / (1.0 - drop.p)
    reuse_ok = bool(jnp.array_equal(y1, y2))
    # every output is either dropped (0) or x * 1/(1-p)
    vals_ok = bool(jnp.all(
        jnp.isclose(y1, 0.0, atol=1e-6)
        | jnp.isclose(y1, x * scale, rtol=1e-5, atol=1e-6)))
    keep_frac = float(jnp.mean((y1 != 0.0).astype(jnp.float32)))
    frac_ok = 0.3 < keep_frac < 0.7     # ~0.5 expected for p=0.5

    drop.training = False
    y_eval = drop(x)
    jax.block_until_ready(y_eval)
    eval_ok = bool(jnp.array_equal(y_eval, x))

    assert reuse_ok and vals_ok and frac_ok and eval_ok
    print("KERNEL_OK")
</pallas_src>

<mosaic_0001>
module attributes {stable_mosaic.version = 11 : i64} {
  func.func @_mask_kernel(%arg0: i32, %arg1: memref<32x128xi32, #tpu.memory_space<vmem>>, %arg2: memref<32x128xi8, #tpu.memory_space<vmem>>) attributes {dimension_semantics = [#tpu.dimension_semantics<parallel>], iteration_bounds = array<i64: 1>, scalar_prefetch = 0 : i64, scratch_operands = 0 : i64, tpu.core_type = #tpu.core_type<tc>, window_params = [{transform_indices = @transform_0, window_bounds = array<i64: 32, 128>}, {transform_indices = @transform_1, window_bounds = array<i64: 32, 128>}]} {
    %c0 = arith.constant 0 : index
    %c0_0 = arith.constant 0 : index
    %0 = vector.load %arg1[%c0, %c0_0] : memref<32x128xi32, #tpu.memory_space<vmem>>, vector<32x128xi32>
    %c-2147483648_i32 = arith.constant -2147483648 : i32
    %1 = vector.broadcast %c-2147483648_i32 : i32 to vector<32x128xi32>
    %2 = arith.cmpi uge, %0, %1 : vector<32x128xi32>
    %3 = arith.extui %2 : vector<32x128xi1> to vector<32x128xi8>
    %c0_1 = arith.constant 0 : index
    %c0_2 = arith.constant 0 : index
    %4 = vector.load %arg2[%c0_1, %c0_2] : memref<32x128xi8, #tpu.memory_space<vmem>>, vector<32x128xi8>
    tpu.vector_store %arg2[%c0_1, %c0_2], %3 {strides = array<i32>} : memref<32x128xi8, #tpu.memory_space<vmem>>, vector<32x128xi8>,
    return
  }
  func.func @transform_0(%arg0: i32) -> (i32, i32) {
    %c0_i32 = arith.constant 0 : i32
    %c0_i32_0 = arith.constant 0 : i32
    return %arg0, %c0_i32 : i32, i32
  }
  func.func @transform_1(%arg0: i32) -> (i32, i32) {
    %c0_i32 = arith.constant 0 : i32
    %c0_i32_0 = arith.constant 0 : i32
    return %arg0, %c0_i32 : i32, i32
  }
}

</mosaic_0001>

<bundles_post_ra>
// kernel: tpu_custom_call.1
= control target key start
LH: loop header
LB: loop body
LE: loop exit
PB: predicated region body
PF: predicated region fallthrough
CT: control target
= control target key end

     0   :  { %6 = vsyncpa [#allocation3], 0  ;;  %s123_s0 = inlined_call_operand.hbm [shape: u32[32,128], index: 0, kind: input, shape index: {}]   ;;  %s124_s1 = inlined_call_operand.hbm [shape: s8[32,128], index: 1, kind: output, shape index: {}]  }
   0x1   :  { %7 = vsyncpa [#allocation4], 0  ;;  %s102_s6 = smov [#allocation2]  }
   0x2   :  { %s13_s7 = sshll.u32 %s102_s6, 4  ;;  %s14_s7 = int_to_ptr.vmem [resolvable:$true] %s13_s7 }
   0x3   :  { %s66_s8 = scalar_lea.vmem %s14_s7, 512  ;;  %p71_p1 = scmp.lt.s32.totalorder %s14_s7, %s14_s7 }
   0x4   :  { %p67_p0 = scmp.ne.s32.totalorder %s14_s7, %s66_s8  ;;  %p72_p2 = scmp.lt.s32.totalorder %s66_s8, %s66_s8 }
   0x6   :  { %p73_p3 = por %p72_p2, %p71_p1 }
   0x8   :  { %p74_p4 = pnand %p73_p3, %p67_p0 }
   0xa   :  { %77 = shalt.err (!%p74_p4)
}
   0xb   :  { %s103_s9 = smov 128   ;;  %s104_s10 = smov 8  }
   0xc   :  { %19 = dma.hbm_to_vmem [thread:$0]  %s123_s0, 512, %s14_s7, [#allocation3], %s103_s9, %s103_s9, %s104_s10  }
   0xd   :  { %98 = dma.done.wait [#allocation3], 512  }
   0xe   :  { %99 = vsyncadd [#allocation3], 4294966784  ;;  %v25_v0 = vld [vmem:[#allocation2] sm:$0xff]  ;;  %v26_v1 = vld [vmem:[#allocation2 + $0x8] sm:$0xff]  ;;  %s105_s13 = smov [#allocation5]   ;;  %v106_v4 = vmov 0  }
   0xf   :  { %v27_v2 = vld [vmem:[#allocation2 + $0x10] sm:$0xff]  ;;  %v28_v3 = vld [vmem:[#allocation2 + $0x18] sm:$0xff]  ;;  %vm29_vm0 = vcmp.ge.u32.totalorder %v25_v0, 2147483648  ;;  %vm30_vm1 = vcmp.ge.u32.totalorder %v26_v1, 2147483648  ;;  %s44_s14 = sshll.u32 %s105_s13, 4  ;;  %s45_s14 = int_to_ptr.vmem [resolvable:$true] %s44_s14 }
  0x10   :  { %vm31_vm2 = vcmp.ge.u32.totalorder %v27_v2, 2147483648  ;;  %vm32_vm3 = vcmp.ge.u32.totalorder %v28_v3, 2147483648  ;;  %vm33_vm4 = vmpackc.low %vm30_vm1, %vm29_vm0  ;;  %s78_s0 = scalar_lea.vmem %s45_s14, 128  ;;  %p83_p6 = scmp.lt.s32.totalorder %s45_s14, %s45_s14 }
  0x11   :  { %vm34_vm5 = vmpackc.low %vm32_vm3, %vm31_vm2  ;;  %p79_p5 = scmp.ne.s32.totalorder %s45_s14, %s78_s0  ;;  %p84_p7 = scmp.lt.s32.totalorder %s78_s0, %s78_s0 }
  0x12   :  { %vm35_vm6 = vmpackc.even %vm34_vm5, %vm33_vm4 }
  0x13   :  { %v36_v5 = vsel %vm35_vm6, 16843009, %v106_v4  ;;  %p85_p8 = por %p84_p7, %p83_p6 }
  0x14   :  { %37 = vst [vmem:[#allocation5] sm:$0xff] %v36_v5 }
  0x15   :  { %p86_p9 = pnand %p85_p8, %p79_p5 }
  0x17   :  { %89 = shalt.err (!%p86_p9)
}
  0x18   :  { %47 = dma.vmem_to_hbm [thread:$0]  %s45_s14, 128, %s124_s1, [#allocation4]  }
  0x19   :  { %100 = dma.done.wait [#allocation4], 128  }
  0x1a   :  { %101 = vsyncadd [#allocation4], 4294967168 }
  0x1b   :  { %51 = vsyncpa [#allocation3], 1 }
  0x1c   :  { %52 = vsyncpa [#allocation4], 1 }

</bundles_post_ra>
